<compile_context>
chip_gen: v6e
topology: v6e:2x2x1
jax: 0.10.0
libtpu: 0.0.40
codegen_flags: <defaults>
</compile_context>

<pallas_src>
import functools

import numpy as np
import jax
import jax.numpy as jnp
from jax.experimental import pallas as pl
from jax.experimental.pallas import tpu as pltpu

IMAGE_SIZE = 784
HID1 = 100
HID2 = 50
LABELS_COUNT = 10
BN_EPS = 1e-5

# Lane-width padded feature dims (hidden/output only; the 784 input K stays
# unpadded).
PAD_H1 = 128
PAD_H2 = 128
PAD_OUT = 128

NEG_BIG = -1e30        # beta padding for dead logit lanes (exp underflows to 0)
MAX_TILE_B = 512       # batch rows per grid step (>=512 per review, mult of 8)


def _round_up(a, m):
    return ((a + m - 1) // m) * m


def _bn_apply(h, s, sq, gamma, beta, inv_n, relu):
    """Training-mode BatchNorm1d as a fused scale/shift given sum / sumsq."""
    mean = s * inv_n
    var = jnp.maximum(sq * inv_n - mean * mean, 0.0)   # biased variance
    scale = gamma * jax.lax.rsqrt(var + BN_EPS)        # EUP rsqrt
    shift = beta - mean * scale
    out = h * scale + shift                            # one FMA per element
    if relu:
        out = jnp.maximum(out, 0.0)
    return out


def _bn_layer(h, gamma, beta, inv_n, relu):
    s = jnp.sum(h, axis=0, keepdims=True)
    sq = jnp.sum(h * h, axis=0, keepdims=True)
    return _bn_apply(h, s, sq, gamma, beta, inv_n, relu)


def _mask_pad_rows(h, batch, batch_pad):
    """Zero rows >= batch so padded batch rows never pollute BN statistics."""
    if batch_pad == batch:
        return h
    row = jax.lax.broadcasted_iota(jnp.int32, h.shape, 0)
    return jnp.where(row < batch, h, 0.0)


def modeld_kernel(x_ref,
                  w0_ref, g0_ref, be0_ref,
                  w1_ref, g1_ref, be1_ref,
                  w2_ref, g2_ref, be2_ref,
                  o_ref,
                  h0_ref, sum_ref, sq_ref,
                  *, batch, batch_pad, tile_b):
    step = pl.program_id(0)
    nsteps = pl.num_programs(0)
    inv_n = 1.0 / batch   # true batch size: padded rows are exactly zero

    @pl.when(step == 0)
    def _init():
        sum_ref[...] = jnp.zeros_like(sum_ref)
        sq_ref[...] = jnp.zeros_like(sq_ref)

    # fc0 on this batch tile: bf16 x bf16 MXU matmul, f32 accumulation.
    # (bias dropped: it cancels under the batch-mean subtraction of BN0)
    xt = x_ref[...].astype(jnp.bfloat16)
    h0 = jnp.dot(xt, w0_ref[...], preferred_element_type=jnp.float32)

    off = pl.multiple_of(step * tile_b, tile_b)
    h0_ref[pl.ds(off, tile_b), :] = h0
    sum_ref[...] += jnp.sum(h0, axis=0, keepdims=True)
    sq_ref[...] += jnp.sum(h0 * h0, axis=0, keepdims=True)

    @pl.when(step == nsteps - 1)
    def _finalize():
        # bn0 + relu on the whole (now resident) batch.
        h = _bn_apply(h0_ref[...], sum_ref[...], sq_ref[...],
                      g0_ref[...], be0_ref[...], inv_n, relu=True)
        h = _mask_pad_rows(h, batch, batch_pad)

        # fc1 -> bn1 -> relu
        h = jnp.dot(h.astype(jnp.bfloat16), w1_ref[...],
                    preferred_element_type=jnp.float32)
        h = _bn_layer(h, g1_ref[...], be1_ref[...], inv_n, relu=True)
        h = _mask_pad_rows(h, batch, batch_pad)

        # fc2 -> bn2 (padded logit lanes come out at ~-1e30 via beta padding)
        h = jnp.dot(h.astype(jnp.bfloat16), w2_ref[...],
                    preferred_element_type=jnp.float32)
        h = _bn_layer(h, g2_ref[...], be2_ref[...], inv_n, relu=False)

        # log_softmax over the lane dim; dead lanes exp-underflow to 0.
        m = jnp.max(h, axis=-1, keepdims=True)
        z = h - m
        lse = jnp.log(jnp.sum(jnp.exp(z), axis=-1, keepdims=True))
        o_ref[...] = z - lse


@jax.jit
def modeld_forward(x_img, packed):
    """x_img: (B, 1, 28, 28) float32 (NCHW).  Returns (B, 10) log-probs."""
    b = x_img.shape[0]
    x = x_img.reshape(b, IMAGE_SIZE)              # == x.view(-1, 784), no pad

    b8 = _round_up(max(b, 1), 8)
    tb = min(MAX_TILE_B, b8)                      # batch tile, multiple of 8
    b_pad = _round_up(b, tb)
    nt = b_pad // tb
    if b_pad != b:
        # Zero rows contribute nothing to the (1/B-normalized) BN sums.
        x = jnp.pad(x, ((0, b_pad - b), (0, 0)))

    (w0p, g0p, be0p, w1p, g1p, be1p, w2p, g2p, be2p) = packed

    kernel = functools.partial(modeld_kernel, batch=b, batch_pad=b_pad,
                               tile_b=tb)

    full = lambda i: (0, 0)
    grid_spec = pltpu.PrefetchScalarGridSpec(
        num_scalar_prefetch=0,
        grid=(nt,),
        in_specs=[
            pl.BlockSpec((tb, IMAGE_SIZE), lambda i: (i, 0)),   # x tile
            pl.BlockSpec((IMAGE_SIZE, PAD_H1), full),           # w0 (bf16)
            pl.BlockSpec((1, PAD_H1), full),                    # gamma0
            pl.BlockSpec((1, PAD_H1), full),                    # beta0
            pl.BlockSpec((PAD_H1, PAD_H2), full),               # w1 (bf16)
            pl.BlockSpec((1, PAD_H2), full),                    # gamma1
            pl.BlockSpec((1, PAD_H2), full),                    # beta1
            pl.BlockSpec((PAD_H2, PAD_OUT), full),              # w2 (bf16)
            pl.BlockSpec((1, PAD_OUT), full),                   # gamma2
            pl.BlockSpec((1, PAD_OUT), full),                   # beta2
        ],
        out_specs=pl.BlockSpec((b_pad, PAD_OUT), full),
        scratch_shapes=[
            pltpu.VMEM((b_pad, PAD_H1), jnp.float32),   # resident h0
            pltpu.VMEM((1, PAD_H1), jnp.float32),       # sum(h0)
            pltpu.VMEM((1, PAD_H1), jnp.float32),       # sum(h0*h0)
        ],
    )

    # VMEM sizing: x double-buffer + bf16 weights + resident h0/output +
    # finalize temporaries (h*h, bf16 casts, ...), with per-generation cap.
    est = (2 * tb * IMAGE_SIZE * 4
           + 2 * 2 * (IMAGE_SIZE * PAD_H1 + PAD_H1 * PAD_H2 + PAD_H2 * PAD_OUT)
           + b_pad * PAD_H1 * 4
           + 2 * b_pad * PAD_OUT * 4
           + 8 * b_pad * PAD_H1 * 4
           + (2 << 20))
    try:
        phys = pltpu.get_tpu_info().vmem_capacity_bytes
    except Exception:
        phys = 64 << 20
    cap = (100 << 20) if phys > (96 << 20) else (48 << 20)
    vmem_limit = int(min(max(est, 32 << 20), cap))

    out = pl.pallas_call(
        kernel,
        out_shape=jax.ShapeDtypeStruct((b_pad, PAD_OUT), jnp.float32),
        grid_spec=grid_spec,
        compiler_params=pltpu.CompilerParams(
            dimension_semantics=("arbitrary",),
            vmem_limit_bytes=vmem_limit),
    )(x, w0p, g0p, be0p, w1p, g1p, be1p, w2p, g2p, be2p)
    return out[:b, :LABELS_COUNT]


def init_params(key):
    """Deterministic init matching nn.Linear defaults; BN gamma=1, beta=0.
    Linear weights are stored transposed: (in_features, out_features)."""
    def linear(key, fan_in, fan_out):
        kw, kb = jax.random.split(key)
        bound = 1.0 / np.sqrt(fan_in)
        w = jax.random.uniform(kw, (fan_in, fan_out), jnp.float32, -bound, bound)
        b = jax.random.uniform(kb, (1, fan_out), jnp.float32, -bound, bound)
        return w, b

    k0, k1, k2 = jax.random.split(key, 3)
    w0, b0 = linear(k0, IMAGE_SIZE, HID1)
    w1, b1 = linear(k1, HID1, HID2)
    w2, b2 = linear(k2, HID2, LABELS_COUNT)

    def bn_params(n):
        return jnp.ones((1, n), jnp.float32), jnp.zeros((1, n), jnp.float32)

    g0, be0 = bn_params(HID1)
    g1, be1 = bn_params(HID2)
    g2, be2 = bn_params(LABELS_COUNT)
    return (w0, b0, g0, be0, w1, b1, g1, be1, w2, b2, g2, be2)


def pack_params(params):
    """One-time packing: pad feature dims to 128 lanes and cast weights to
    bf16.  Linear biases are dropped (they cancel under training-mode BN)."""
    (w0, b0, g0, be0, w1, b1, g1, be1, w2, b2, g2, be2) = params
    del b0, b1, b2  # dead: bias before training-mode BN cancels exactly

    def pad2(a, rows, cols):
        return jnp.pad(a, ((0, rows - a.shape[0]), (0, cols - a.shape[1])))

    w0p = pad2(w0, IMAGE_SIZE, PAD_H1).astype(jnp.bfloat16)
    w1p = pad2(w1, PAD_H1, PAD_H2).astype(jnp.bfloat16)
    w2p = pad2(w2, PAD_H2, PAD_OUT).astype(jnp.bfloat16)

    g0p, be0p = pad2(g0, 1, PAD_H1), pad2(be0, 1, PAD_H1)
    g1p, be1p = pad2(g1, 1, PAD_H2), pad2(be1, 1, PAD_H2)
    g2p = pad2(g2, 1, PAD_OUT)
    # Dead logit lanes: beta = -1e30 so they exp-underflow in the softmax
    # (gamma padding is 0, so the BN affine yields exactly -1e30 there).
    be2p = jnp.pad(be2, ((0, 0), (0, PAD_OUT - LABELS_COUNT)),
                   constant_values=NEG_BIG)
    return (w0p, g0p, be0p, w1p, g1p, be1p, w2p, g2p, be2p)


def _batchnorm_ref(h, gamma, beta):
    # Exact PyTorch training-mode math (two-pass, includes bias upstream).
    mean = jnp.mean(h, axis=0, keepdims=True)
    c = h - mean
    var = jnp.mean(c * c, axis=0, keepdims=True)
    return c * jax.lax.rsqrt(var + BN_EPS) * gamma + beta


def reference_forward(x_img, params):
    (w0, b0, g0, be0, w1, b1, g1, be1, w2, b2, g2, be2) = params
    x = x_img.reshape(x_img.shape[0], IMAGE_SIZE)
    h = jnp.maximum(_batchnorm_ref(x @ w0 + b0, g0, be0), 0.0)
    h = jnp.maximum(_batchnorm_ref(h @ w1 + b1, g1, be1), 0.0)
    h = _batchnorm_ref(h @ w2 + b2, g2, be2)
    return jax.nn.log_softmax(h, axis=-1)


if __name__ == "__main__":
    key = jax.random.PRNGKey(0)
    kx, kp = jax.random.split(key)

    B = 8
    x_img = jax.random.normal(kx, (B, 1, 28, 28), jnp.float32)  # NCHW
    params = init_params(kp)
    packed = pack_params(params)

    out = modeld_forward(x_img, packed)
    out = jax.block_until_ready(out)

    ref = reference_forward(x_img, params)   # f32 reference (PyTorch math)
    assert out.shape == (B, LABELS_COUNT)
    # Tolerance loosened vs. the f32 reference because the kernel feeds the
    # MXU bf16 inputs (accumulation stays f32).
    np.testing.assert_allclose(np.asarray(out), np.asarray(ref),
                               rtol=5e-2, atol=5e-2)
    print("KERNEL_OK")
</pallas_src>

<mosaic_0001>
module attributes {stable_mosaic.version = 11 : i64} {
  func.func @modeld_kernel(%arg0: i32, %arg1: memref<8x784xf32, #tpu.memory_space<vmem>>, %arg2: memref<784x128xbf16, #tpu.memory_space<vmem>>, %arg3: memref<1x128xf32, #tpu.memory_space<vmem>>, %arg4: memref<1x128xf32, #tpu.memory_space<vmem>>, %arg5: memref<128x128xbf16, #tpu.memory_space<vmem>>, %arg6: memref<1x128xf32, #tpu.memory_space<vmem>>, %arg7: memref<1x128xf32, #tpu.memory_space<vmem>>, %arg8: memref<128x128xbf16, #tpu.memory_space<vmem>>, %arg9: memref<1x128xf32, #tpu.memory_space<vmem>>, %arg10: memref<1x128xf32, #tpu.memory_space<vmem>>, %arg11: memref<8x128xf32, #tpu.memory_space<vmem>>, %arg12: memref<8x128xf32, #tpu.memory_space<vmem>>, %arg13: memref<1x128xf32, #tpu.memory_space<vmem>>, %arg14: memref<1x128xf32, #tpu.memory_space<vmem>>) attributes {dimension_semantics = [#tpu.dimension_semantics<arbitrary>], iteration_bounds = array<i64: 1>, scalar_prefetch = 0 : i64, scratch_operands = 3 : i64, tpu.core_type = #tpu.core_type<tc>, window_params = [{transform_indices = @transform_0, window_bounds = array<i64: 8, 784>}, {pipeline_mode = #tpu.pipeline_mode<synchronous>, transform_indices = @transform_1, window_bounds = array<i64: 784, 128>}, {pipeline_mode = #tpu.pipeline_mode<synchronous>, transform_indices = @transform_2, window_bounds = array<i64: 1, 128>}, {pipeline_mode = #tpu.pipeline_mode<synchronous>, transform_indices = @transform_3, window_bounds = array<i64: 1, 128>}, {pipeline_mode = #tpu.pipeline_mode<synchronous>, transform_indices = @transform_4, window_bounds = array<i64: 128, 128>}, {pipeline_mode = #tpu.pipeline_mode<synchronous>, transform_indices = @transform_5, window_bounds = array<i64: 1, 128>}, {pipeline_mode = #tpu.pipeline_mode<synchronous>, transform_indices = @transform_6, window_bounds = array<i64: 1, 128>}, {pipeline_mode = #tpu.pipeline_mode<synchronous>, transform_indices = @transform_7, window_bounds = array<i64: 128, 128>}, {pipeline_mode = #tpu.pipeline_mode<synchronous>, transform_indices = @transform_8, window_bounds = array<i64: 1, 128>}, {pipeline_mode = #tpu.pipeline_mode<synchronous>, transform_indices = @transform_9, window_bounds = array<i64: 1, 128>}, {pipeline_mode = #tpu.pipeline_mode<synchronous>, transform_indices = @transform_10, window_bounds = array<i64: 8, 128>}]} {
    %c0_i32 = arith.constant 0 : i32
    %0 = arith.cmpi eq, %arg0, %c0_i32 : i32
    %1 = arith.extui %0 : i1 to i32
    %c0_i32_0 = arith.constant 0 : i32
    %2 = arith.cmpi ne, %1, %c0_i32_0 : i32
    scf.if %2 {
      %cst_17 = arith.constant 0.000000e+00 : f32
      %25 = vector.broadcast %cst_17 : f32 to vector<1x128xf32>
      %c0_18 = arith.constant 0 : index
      %c0_19 = arith.constant 0 : index
      %26 = vector.load %arg13[%c0_18, %c0_19] : memref<1x128xf32, #tpu.memory_space<vmem>>, vector<1x128xf32>
      tpu.vector_store %arg13[%c0_18, %c0_19], %25 {strides = array<i32>} : memref<1x128xf32, #tpu.memory_space<vmem>>, vector<1x128xf32>,
      %cst_20 = arith.constant 0.000000e+00 : f32
      %27 = vector.broadcast %cst_20 : f32 to vector<1x128xf32>
      %c0_21 = arith.constant 0 : index
      %c0_22 = arith.constant 0 : index
      %28 = vector.load %arg14[%c0_21, %c0_22] : memref<1x128xf32, #tpu.memory_space<vmem>>, vector<1x128xf32>
      tpu.vector_store %arg14[%c0_21, %c0_22], %27 {strides = array<i32>} : memref<1x128xf32, #tpu.memory_space<vmem>>, vector<1x128xf32>,
    } else {
    }
    %c0 = arith.constant 0 : index
    %c0_1 = arith.constant 0 : index
    %3 = vector.load %arg1[%c0, %c0_1] : memref<8x784xf32, #tpu.memory_space<vmem>>, vector<8x784xf32>
    %4 = arith.truncf %3 : vector<8x784xf32> to vector<8x784xbf16>
    %c0_2 = arith.constant 0 : index
    %c0_3 = arith.constant 0 : index
    %5 = vector.load %arg2[%c0_2, %c0_3] : memref<784x128xbf16, #tpu.memory_space<vmem>>, vector<784x128xbf16>
    %cst = arith.constant dense<0.000000e+00> : vector<8x128xf32>
    %6 = tpu.matmul %4, %5, %cst {dimension_numbers = #tpu.dot_dimension_numbers<[1], [0], [0], [1], [0, 0, 1, 1], [], []>} : vector<8x784xbf16>, vector<784x128xbf16>, vector<8x128xf32> -> vector<8x128xf32>
    %c8_i32 = arith.constant 8 : i32
    %7 = arith.muli %arg0, %c8_i32 : i32
    %8 = tpu.assume_multiple %7, 8 : i32
    %9 = arith.index_cast %8 : i32 to index
    %c0_4 = arith.constant 0 : index
    %10 = vector.load %arg12[%9, %c0_4] : memref<8x128xf32, #tpu.memory_space<vmem>>, vector<8x128xf32>
    tpu.vector_store %arg12[%9, %c0_4], %6 {strides = array<i32>} : memref<8x128xf32, #tpu.memory_space<vmem>>, vector<8x128xf32>,
    %c0_5 = arith.constant 0 : index
    %c0_6 = arith.constant 0 : index
    %11 = vector.load %arg13[%c0_5, %c0_6] : memref<1x128xf32, #tpu.memory_space<vmem>>, vector<1x128xf32>
    %cst_7 = arith.constant dense<0.000000e+00> : vector<128xf32>
    %12 = vector.multi_reduction <add>, %6, %cst_7 [0] : vector<8x128xf32> to vector<128xf32>
    %13 = vector.shape_cast %12 : vector<128xf32> to vector<1x128xf32>
    %14 = arith.addf %11, %13 : vector<1x128xf32>
    %c0_8 = arith.constant 0 : index
    %c0_9 = arith.constant 0 : index
    %15 = vector.load %arg13[%c0_8, %c0_9] : memref<1x128xf32, #tpu.memory_space<vmem>>, vector<1x128xf32>
    tpu.vector_store %arg13[%c0_8, %c0_9], %14 {strides = array<i32>} : memref<1x128xf32, #tpu.memory_space<vmem>>, vector<1x128xf32>,
    %c0_10 = arith.constant 0 : index
    %c0_11 = arith.constant 0 : index
    %16 = vector.load %arg14[%c0_10, %c0_11] : memref<1x128xf32, #tpu.memory_space<vmem>>, vector<1x128xf32>
    %17 = arith.mulf %6, %6 : vector<8x128xf32>
    %cst_12 = arith.constant dense<0.000000e+00> : vector<128xf32>
    %18 = vector.multi_reduction <add>, %17, %cst_12 [0] : vector<8x128xf32> to vector<128xf32>
    %19 = vector.shape_cast %18 : vector<128xf32> to vector<1x128xf32>
    %20 = arith.addf %16, %19 : vector<1x128xf32>
    %c0_13 = arith.constant 0 : index
    %c0_14 = arith.constant 0 : index
    %21 = vector.load %arg14[%c0_13, %c0_14] : memref<1x128xf32, #tpu.memory_space<vmem>>, vector<1x128xf32>
    tpu.vector_store %arg14[%c0_13, %c0_14], %20 {strides = array<i32>} : memref<1x128xf32, #tpu.memory_space<vmem>>, vector<1x128xf32>,
    %c0_i32_15 = arith.constant 0 : i32
    %22 = arith.cmpi eq, %arg0, %c0_i32_15 : i32
    %23 = arith.extui %22 : i1 to i32
    %c0_i32_16 = arith.constant 0 : i32
    %24 = arith.cmpi ne, %23, %c0_i32_16 : i32
    scf.if %24 {
      %c0_17 = arith.constant 0 : index
      %c0_18 = arith.constant 0 : index
      %25 = vector.load %arg12[%c0_17, %c0_18] : memref<8x128xf32, #tpu.memory_space<vmem>>, vector<8x128xf32>
      %c0_19 = arith.constant 0 : index
      %c0_20 = arith.constant 0 : index
      %26 = vector.load %arg13[%c0_19, %c0_20] : memref<1x128xf32, #tpu.memory_space<vmem>>, vector<1x128xf32>
      %c0_21 = arith.constant 0 : index
      %c0_22 = arith.constant 0 : index
      %27 = vector.load %arg14[%c0_21, %c0_22] : memref<1x128xf32, #tpu.memory_space<vmem>>, vector<1x128xf32>
      %c0_23 = arith.constant 0 : index
      %c0_24 = arith.constant 0 : index
      %28 = vector.load %arg3[%c0_23, %c0_24] : memref<1x128xf32, #tpu.memory_space<vmem>>, vector<1x128xf32>
      %c0_25 = arith.constant 0 : index
      %c0_26 = arith.constant 0 : index
      %29 = vector.load %arg4[%c0_25, %c0_26] : memref<1x128xf32, #tpu.memory_space<vmem>>, vector<1x128xf32>
      %cst_27 = arith.constant 1.250000e-01 : f32
      %30 = vector.broadcast %cst_27 : f32 to vector<1x128xf32>
      %31 = arith.mulf %26, %30 : vector<1x128xf32>
      %cst_28 = arith.constant 1.250000e-01 : f32
      %32 = vector.broadcast %cst_28 : f32 to vector<1x128xf32>
      %33 = arith.mulf %27, %32 : vector<1x128xf32>
      %34 = arith.mulf %31, %31 : vector<1x128xf32>
      %35 = arith.subf %33, %34 : vector<1x128xf32>
      %cst_29 = arith.constant 0.000000e+00 : f32
      %36 = vector.broadcast %cst_29 : f32 to vector<1x128xf32>
      %37 = arith.maximumf %35, %36 : vector<1x128xf32>
      %cst_30 = arith.constant 9.99999974E-6 : f32
      %38 = vector.broadcast %cst_30 : f32 to vector<1x128xf32>
      %39 = arith.addf %37, %38 : vector<1x128xf32>
      %40 = math.rsqrt %39 : vector<1x128xf32>
      %41 = arith.mulf %28, %40 : vector<1x128xf32>
      %42 = arith.mulf %31, %41 : vector<1x128xf32>
      %43 = arith.subf %29, %42 : vector<1x128xf32>
      %44 = vector.broadcast %41 : vector<1x128xf32> to vector<8x128xf32>
      %45 = arith.mulf %25, %44 : vector<8x128xf32>
      %46 = vector.broadcast %43 : vector<1x128xf32> to vector<8x128xf32>
      %47 = arith.addf %45, %46 : vector<8x128xf32>
      %cst_31 = arith.constant 0.000000e+00 : f32
      %48 = vector.broadcast %cst_31 : f32 to vector<8x128xf32>
      %49 = arith.maximumf %47, %48 : vector<8x128xf32>
      %50 = arith.truncf %49 : vector<8x128xf32> to vector<8x128xbf16>
      %c0_32 = arith.constant 0 : index
      %c0_33 = arith.constant 0 : index
      %51 = vector.load %arg5[%c0_32, %c0_33] : memref<128x128xbf16, #tpu.memory_space<vmem>>, vector<128x128xbf16>
      %cst_34 = arith.constant dense<0.000000e+00> : vector<8x128xf32>
      %52 = tpu.matmul %50, %51, %cst_34 {dimension_numbers = #tpu.dot_dimension_numbers<[1], [0], [0], [1], [0, 0, 1, 1], [], []>} : vector<8x128xbf16>, vector<128x128xbf16>, vector<8x128xf32> -> vector<8x128xf32>
      %c0_35 = arith.constant 0 : index
      %c0_36 = arith.constant 0 : index
      %53 = vector.load %arg6[%c0_35, %c0_36] : memref<1x128xf32, #tpu.memory_space<vmem>>, vector<1x128xf32>
      %c0_37 = arith.constant 0 : index
      %c0_38 = arith.constant 0 : index
      %54 = vector.load %arg7[%c0_37, %c0_38] : memref<1x128xf32, #tpu.memory_space<vmem>>, vector<1x128xf32>
      %cst_39 = arith.constant dense<0.000000e+00> : vector<128xf32>
      %55 = vector.multi_reduction <add>, %52, %cst_39 [0] : vector<8x128xf32> to vector<128xf32>
      %56 = vector.shape_cast %55 : vector<128xf32> to vector<1x128xf32>
      %57 = arith.mulf %52, %52 : vector<8x128xf32>
      %cst_40 = arith.constant dense<0.000000e+00> : vector<128xf32>
      %58 = vector.multi_reduction <add>, %57, %cst_40 [0] : vector<8x128xf32> to vector<128xf32>
      %59 = vector.shape_cast %58 : vector<128xf32> to vector<1x128xf32>
      %cst_41 = arith.constant 1.250000e-01 : f32
      %60 = vector.broadcast %cst_41 : f32 to vector<1x128xf32>
      %61 = arith.mulf %56, %60 : vector<1x128xf32>
      %cst_42 = arith.constant 1.250000e-01 : f32
      %62 = vector.broadcast %cst_42 : f32 to vector<1x128xf32>
      %63 = arith.mulf %59, %62 : vector<1x128xf32>
      %64 = arith.mulf %61, %61 : vector<1x128xf32>
      %65 = arith.subf %63, %64 : vector<1x128xf32>
      %cst_43 = arith.constant 0.000000e+00 : f32
      %66 = vector.broadcast %cst_43 : f32 to vector<1x128xf32>
      %67 = arith.maximumf %65, %66 : vector<1x128xf32>
      %cst_44 = arith.constant 9.99999974E-6 : f32
      %68 = vector.broadcast %cst_44 : f32 to vector<1x128xf32>
      %69 = arith.addf %67, %68 : vector<1x128xf32>
      %70 = math.rsqrt %69 : vector<1x128xf32>
      %71 = arith.mulf %53, %70 : vector<1x128xf32>
      %72 = arith.mulf %61, %71 : vector<1x128xf32>
      %73 = arith.subf %54, %72 : vector<1x128xf32>
      %74 = vector.broadcast %71 : vector<1x128xf32> to vector<8x128xf32>
      %75 = arith.mulf %52, %74 : vector<8x128xf32>
      %76 = vector.broadcast %73 : vector<1x128xf32> to vector<8x128xf32>
      %77 = arith.addf %75, %76 : vector<8x128xf32>
      %cst_45 = arith.constant 0.000000e+00 : f32
      %78 = vector.broadcast %cst_45 : f32 to vector<8x128xf32>
      %79 = arith.maximumf %77, %78 : vector<8x128xf32>
      %80 = arith.truncf %79 : vector<8x128xf32> to vector<8x128xbf16>
      %c0_46 = arith.constant 0 : index
      %c0_47 = arith.constant 0 : index
      %81 = vector.load %arg8[%c0_46, %c0_47] : memref<128x128xbf16, #tpu.memory_space<vmem>>, vector<128x128xbf16>
      %cst_48 = arith.constant dense<0.000000e+00> : vector<8x128xf32>
      %82 = tpu.matmul %80, %81, %cst_48 {dimension_numbers = #tpu.dot_dimension_numbers<[1], [0], [0], [1], [0, 0, 1, 1], [], []>} : vector<8x128xbf16>, vector<128x128xbf16>, vector<8x128xf32> -> vector<8x128xf32>
      %c0_49 = arith.constant 0 : index
      %c0_50 = arith.constant 0 : index
      %83 = vector.load %arg9[%c0_49, %c0_50] : memref<1x128xf32, #tpu.memory_space<vmem>>, vector<1x128xf32>
      %c0_51 = arith.constant 0 : index
      %c0_52 = arith.constant 0 : index
      %84 = vector.load %arg10[%c0_51, %c0_52] : memref<1x128xf32, #tpu.memory_space<vmem>>, vector<1x128xf32>
      %cst_53 = arith.constant dense<0.000000e+00> : vector<128xf32>
      %85 = vector.multi_reduction <add>, %82, %cst_53 [0] : vector<8x128xf32> to vector<128xf32>
      %86 = vector.shape_cast %85 : vector<128xf32> to vector<1x128xf32>
      %87 = arith.mulf %82, %82 : vector<8x128xf32>
      %cst_54 = arith.constant dense<0.000000e+00> : vector<128xf32>
      %88 = vector.multi_reduction <add>, %87, %cst_54 [0] : vector<8x128xf32> to vector<128xf32>
      %89 = vector.shape_cast %88 : vector<128xf32> to vector<1x128xf32>
      %cst_55 = arith.constant 1.250000e-01 : f32
      %90 = vector.broadcast %cst_55 : f32 to vector<1x128xf32>
      %91 = arith.mulf %86, %90 : vector<1x128xf32>
      %cst_56 = arith.constant 1.250000e-01 : f32
      %92 = vector.broadcast %cst_56 : f32 to vector<1x128xf32>
      %93 = arith.mulf %89, %92 : vector<1x128xf32>
      %94 = arith.mulf %91, %91 : vector<1x128xf32>
      %95 = arith.subf %93, %94 : vector<1x128xf32>
      %cst_57 = arith.constant 0.000000e+00 : f32
      %96 = vector.broadcast %cst_57 : f32 to vector<1x128xf32>
      %97 = arith.maximumf %95, %96 : vector<1x128xf32>
      %cst_58 = arith.constant 9.99999974E-6 : f32
      %98 = vector.broadcast %cst_58 : f32 to vector<1x128xf32>
      %99 = arith.addf %97, %98 : vector<1x128xf32>
      %100 = math.rsqrt %99 : vector<1x128xf32>
      %101 = arith.mulf %83, %100 : vector<1x128xf32>
      %102 = arith.mulf %91, %101 : vector<1x128xf32>
      %103 = arith.subf %84, %102 : vector<1x128xf32>
      %104 = vector.broadcast %101 : vector<1x128xf32> to vector<8x128xf32>
      %105 = arith.mulf %82, %104 : vector<8x128xf32>
      %106 = vector.broadcast %103 : vector<1x128xf32> to vector<8x128xf32>
      %107 = arith.addf %105, %106 : vector<8x128xf32>
      %cst_59 = arith.constant dense<0xFF800000> : vector<8xf32>
      %108 = vector.multi_reduction <maximumf>, %107, %cst_59 [1] : vector<8x128xf32> to vector<8xf32>
      %109 = vector.shape_cast %108 : vector<8xf32> to vector<8x1xf32>
      %110 = vector.broadcast %109 : vector<8x1xf32> to vector<8x128xf32>
      %111 = arith.subf %107, %110 : vector<8x128xf32>
      %112 = math.exp %111 : vector<8x128xf32>
      %cst_60 = arith.constant dense<0.000000e+00> : vector<8xf32>
      %113 = vector.multi_reduction <add>, %112, %cst_60 [1] : vector<8x128xf32> to vector<8xf32>
      %114 = vector.shape_cast %113 : vector<8xf32> to vector<8x1xf32>
      %115 = math.log %114 : vector<8x1xf32>
      %116 = vector.broadcast %115 : vector<8x1xf32> to vector<8x128xf32>
      %117 = arith.subf %111, %116 : vector<8x128xf32>
      %c0_61 = arith.constant 0 : index
      %c0_62 = arith.constant 0 : index
      %118 = vector.load %arg11[%c0_61, %c0_62] : memref<8x128xf32, #tpu.memory_space<vmem>>, vector<8x128xf32>
      tpu.vector_store %arg11[%c0_61, %c0_62], %117 {strides = array<i32>} : memref<8x128xf32, #tpu.memory_space<vmem>>, vector<8x128xf32>,
    } else {
    }
    return
  }
  func.func @transform_0(%arg0: i32) -> (i32, i32) {
    %c0_i32 = arith.constant 0 : i32
    %c0_i32_0 = arith.constant 0 : i32
    return %arg0, %c0_i32 : i32, i32
  }
  func.func @transform_1(%arg0: i32) -> (i32, i32) {
    %c0_i32 = arith.constant 0 : i32
    %c0_i32_0 = arith.constant 0 : i32
    %c0_i32_1 = arith.constant 0 : i32
    return %c0_i32, %c0_i32_0 : i32, i32
  }
  func.func @transform_2(%arg0: i32) -> (i32, i32) {
    %c0_i32 = arith.constant 0 : i32
    %c0_i32_0 = arith.constant 0 : i32
    %c0_i32_1 = arith.constant 0 : i32
    return %c0_i32, %c0_i32_0 : i32, i32
  }
  func.func @transform_3(%arg0: i32) -> (i32, i32) {
    %c0_i32 = arith.constant 0 : i32
    %c0_i32_0 = arith.constant 0 : i32
    %c0_i32_1 = arith.constant 0 : i32
    return %c0_i32, %c0_i32_0 : i32, i32
  }
  func.func @transform_4(%arg0: i32) -> (i32, i32) {
    %c0_i32 = arith.constant 0 : i32
    %c0_i32_0 = arith.constant 0 : i32
    %c0_i32_1 = arith.constant 0 : i32
    return %c0_i32, %c0_i32_0 : i32, i32
  }
  func.func @transform_5(%arg0: i32) -> (i32, i32) {
    %c0_i32 = arith.constant 0 : i32
    %c0_i32_0 = arith.constant 0 : i32
    %c0_i32_1 = arith.constant 0 : i32
    return %c0_i32, %c0_i32_0 : i32, i32
  }
  func.func @transform_6(%arg0: i32) -> (i32, i32) {
    %c0_i32 = arith.constant 0 : i32
    %c0_i32_0 = arith.constant 0 : i32
    %c0_i32_1 = arith.constant 0 : i32
    return %c0_i32, %c0_i32_0 : i32, i32
  }
  func.func @transform_7(%arg0: i32) -> (i32, i32) {
    %c0_i32 = arith.constant 0 : i32
    %c0_i32_0 = arith.constant 0 : i32
    %c0_i32_1 = arith.constant 0 : i32
    return %c0_i32, %c0_i32_0 : i32, i32
  }
  func.func @transform_8(%arg0: i32) -> (i32, i32) {
    %c0_i32 = arith.constant 0 : i32
    %c0_i32_0 = arith.constant 0 : i32
    %c0_i32_1 = arith.constant 0 : i32
    return %c0_i32, %c0_i32_0 : i32, i32
  }
  func.func @transform_9(%arg0: i32) -> (i32, i32) {
    %c0_i32 = arith.constant 0 : i32
    %c0_i32_0 = arith.constant 0 : i32
    %c0_i32_1 = arith.constant 0 : i32
    return %c0_i32, %c0_i32_0 : i32, i32
  }
  func.func @transform_10(%arg0: i32) -> (i32, i32) {
    %c0_i32 = arith.constant 0 : i32
    %c0_i32_0 = arith.constant 0 : i32
    %c0_i32_1 = arith.constant 0 : i32
    return %c0_i32, %c0_i32_0 : i32, i32
  }
}

</mosaic_0001>

<bundles_post_ra>
// kernel: modeld_forward.1
= control target key start
LH: loop header
LB: loop body
LE: loop exit
PB: predicated region body
PF: predicated region fallthrough
CT: control target
= control target key end

     0   :  { %v1280_v2 = vmov 0.0   ;;  %vm1281_vm0 = vmmov 0   ;;  %vm449_vm1 = vcmask 130048   ;;  %s1608_s0 = inlined_call_operand.vmem [shape: f32[8,784], index: 0, kind: input, shape index: {}]   ;;  %s1609_s1 = inlined_call_operand.vmem [shape: bf16[784,128], index: 1, kind: input, shape index: {}]   ;;  %s1610_s2 = inlined_call_operand.vmem [shape: f32[1,128], index: 2, kind: input, shape index: {}]   ;;  %s1611_s3 = inlined_call_operand.vmem [shape: f32[1,128], index: 3, kind: input, shape index: {}]   ;;  %s1612_s4 = inlined_call_operand.vmem [shape: bf16[128,128], index: 4, kind: input, shape index: {}]   ;;  %s1613_s5 = inlined_call_operand.vmem [shape: f32[1,128], index: 5, kind: input, shape index: {}]   ;;  %s1614_s6 = inlined_call_operand.vmem [shape: f32[1,128], index: 6, kind: input, shape index: {}]   ;;  %s1615_s7 = inlined_call_operand.vmem [shape: bf16[128,128], index: 7, kind: input, shape index: {}]   ;;  %s1616_s8 = inlined_call_operand.vmem [shape: f32[1,128], index: 8, kind: input, shape index: {}]   ;;  %s1617_s9 = inlined_call_operand.vmem [shape: f32[1,128], index: 9, kind: input, shape index: {}]   ;;  %s1618_s10 = inlined_call_operand.hbm [shape: f32[8,128], index: 10, kind: output, shape index: {}]  }
   0x1   :  { %v1183_v0 = vld [vmem:[%s1609_s1 + $0x78] sm:$0xff]   ;;  %41 = vst [vmem:[#allocation3] sm:$0x1] %v1280_v2  ;;  %42 = vst [vmem:[#allocation4] sm:$0x1] %v1280_v2  ;;  %v1187_v5 = vld [vmem:[%s1609_s1 + $0x70] sm:$0xff]  }
   0x2   :  { %v1184_v1 = vld [vmem:[%s1609_s1 + $0xf8] sm:$0xff]   ;;  %1048 = vmatprep.subr.bf16.mxu0 %v1183_v0  ;;  %v1188_v6 = vld [vmem:[%s1609_s1 + $0xf0] sm:$0xff]   ;;  %v1191_v9 = vld [vmem:[%s1609_s1 + $0x68] sm:$0xff]  }
   0x3   :  { %v1185_v3 = vld [vmem:[%s1609_s1 + $0x38] sm:$0xff]   ;;  %1070 = vmatprep.subr.bf16.mxu1 %v1184_v1  ;;  %v1189_v7 = vld [vmem:[%s1609_s1 + $0x30] sm:$0xff]   ;;  %v1192_v10 = vld [vmem:[%s1609_s1 + $0xe8] sm:$0xff]  }
   0x4   :  { %v1186_v4 = vld [vmem:[%s1609_s1 + $0xb8] sm:$0xff]   ;;  %1049 = vmatpush3.bf16.msra.mxu0 %v1185_v3  ;;  %v1190_v8 = vld [vmem:[%s1609_s1 + $0xb0] sm:$0xff]   ;;  %v1193_v11 = vld [vmem:[%s1609_s1 + $0x28] sm:$0xff]  }
   0x5   :  { %1071 = vmatpush3.bf16.msra.mxu1 %v1186_v4  ;;  %1050 = vmatprep.subr.bf16.mxu0 %v1187_v5  ;;  %v1194_v12 = vld [vmem:[%s1609_s1 + $0xa8] sm:$0xff]   ;;  %v1195_v13 = vld [vmem:[%s1609_s1 + $0x60] sm:$0xff]   ;;  %v1199_v17 = vld [vmem:[%s1609_s1 + $0x58] sm:$0xff]  }
   0x6   :  { %1072 = vmatprep.subr.bf16.mxu1 %v1188_v6  ;;  %v1196_v14 = vld [vmem:[%s1609_s1 + $0xe0] sm:$0xff]   ;;  %v1200_v18 = vld [vmem:[%s1609_s1 + $0xd8] sm:$0xff]   ;;  %v1203_v21 = vld [vmem:[%s1609_s1 + $0x50] sm:$0xff]  }
   0x7   :  { %v1197_v15 = vld [vmem:[%s1609_s1 + $0x20] sm:$0xff]   ;;  %v1201_v19 = vld [vmem:[%s1609_s1 + $0x18] sm:$0xff]   ;;  %v1204_v22 = vld [vmem:[%s1609_s1 + $0xd0] sm:$0xff]  }
   0x8   :  { %1051 = vmatpush3.bf16.msra.mxu0 %v1189_v7  ;;  %v1198_v16 = vld [vmem:[%s1609_s1 + $0xa0] sm:$0xff]   ;;  %v1202_v20 = vld [vmem:[%s1609_s1 + $0x98] sm:$0xff]   ;;  %v1205_v23 = vld [vmem:[%s1609_s1 + $0x10] sm:$0xff]  }
   0x9   :  { %1073 = vmatpush3.bf16.msra.mxu1 %v1190_v8  ;;  %1052 = vmatprep.subr.bf16.mxu0 %v1191_v9  ;;  %v1206_v24 = vld [vmem:[%s1609_s1 + $0x90] sm:$0xff]   ;;  %v1207_v25 = vld [vmem:[%s1609_s1 + $0x48] sm:$0xff]   ;;  %v1211_v29 = vld [vmem:[%s1609_s1 + $0x40] sm:$0xff]  }
   0xa   :  { %1074 = vmatprep.subr.bf16.mxu1 %v1192_v10  ;;  %v1208_v26 = vld [vmem:[%s1609_s1 + $0xc8] sm:$0xff]   ;;  %v1212_v30 = vld [vmem:[%s1609_s1 + $0xc0] sm:$0xff]   ;;  %v46_v34 = vld [vmem:[%s1608_s0 + $0x18] sm:$0xff] }
   0xb   :  { %v1209_v27 = vld [vmem:[%s1609_s1 + $0x8] sm:$0xff]   ;;  %v1213_v31 = vld [vmem:[%s1609_s1] sm:$0xff]   ;;  %v53_v37 = vpack.c.bf16 %v46_v34, %v46_v34  ;;  %v45_v39 = vld [vmem:[%s1608_s0 + $0x10] sm:$0xff] }
   0xc   :  { %1053 = vmatpush3.bf16.msra.mxu0 %v1193_v11  ;;  %v1210_v28 = vld [vmem:[%s1609_s1 + $0x88] sm:$0xff]   ;;  %v1214_v32 = vld [vmem:[%s1609_s1 + $0x80] sm:$0xff]   ;;  %v52_v40 = vpack.c.bf16 %v45_v39, %v45_v39  ;;  %v1215_v41 = vld [vmem:[%s1609_s1 + $0x178] sm:$0xff]  }
   0xd   :  { %1075 = vmatpush3.bf16.msra.mxu1 %v1194_v12  ;;  %1054 = vmatprep.subr.bf16.mxu0 %v1195_v13  ;;  %v44_v33 = vld [vmem:[%s1608_s0 + $0x8] sm:$0xff]  ;;  %v43_v35 = vld [vmem:[%s1608_s0] sm:$0xff]  ;;  %v1216_v42 = vld [vmem:[%s1609_s1 + $0x138] sm:$0xff]  }
   0xe   :  { %1076 = vmatprep.subr.bf16.mxu1 %v1196_v14  ;;  %v51_v36 = vpack.c.bf16 %v44_v33, %v44_v33  ;;  %v50_v38 = vpack.c.bf16 %v43_v35, %v43_v35  ;;  %525 = vmatprep.mubr.bf16.mxu1 %v53_v37  ;;  %v1217_v43 = vld [vmem:[%s1609_s1 + $0x170] sm:$0xff]   ;;  %v1219_v45 = vld [vmem:[%s1609_s1 + $0x168] sm:$0xff]   ;;  %v1221_v47 = vld [vmem:[%s1609_s1 + $0x160] sm:$0xff]  }
   0xf   :  { %v1218_v44 = vld [vmem:[%s1609_s1 + $0x130] sm:$0xff]   ;;  %v1220_v46 = vld [vmem:[%s1609_s1 + $0x128] sm:$0xff]   ;;  %v1222_v48 = vld [vmem:[%s1609_s1 + $0x120] sm:$0xff]  }
  0x10   :  { %1055 = vmatpush3.bf16.msra.mxu0 %v1197_v15  ;;  %485 = vmatprep.mubr.bf16.mxu0 %v51_v36  ;;  %v1223_v49 = vld [vmem:[%s1609_s1 + $0x158] sm:$0xff]   ;;  %v1225_v51 = vld [vmem:[%s1609_s1 + $0x150] sm:$0xff]   ;;  %v1231_v52 = vld [vmem:[%s1609_s1 + $0x180] sm:$0xff]  }
  0x11   :  { %1077 = vmatpush3.bf16.msra.mxu1 %v1198_v16  ;;  %1056 = vmatprep.subr.bf16.mxu0 %v1199_v17  ;;  %v1224_v50 = vld [vmem:[%s1609_s1 + $0x118] sm:$0xff]   ;;  %v48_v53 = vld [vmem:[%s1608_s0 + $0x28] sm:$0xff]  ;;  %v49_v55 = vld [vmem:[%s1608_s0 + $0x30] sm:$0xff] }
  0x12   :  { %1078 = vmatprep.subr.bf16.mxu1 %v1200_v18  ;;  %v55_v54 = vpack.c.bf16 %v48_v53, %v48_v53  ;;  %v1226_v56 = vld [vmem:[%s1609_s1 + $0x110] sm:$0xff]   ;;  %v56_v57 = vpack.c.bf16 %v49_v55, %v49_v55  ;;  %v1227_v58 = vld [vmem:[%s1609_s1 + $0x148] sm:$0xff]   ;;  %v1229_v60 = vld [vmem:[%s1609_s1 + $0x140] sm:$0xff]  }
  0x13   :  { %v1228_v59 = vld [vmem:[%s1609_s1 + $0x108] sm:$0xff]   ;;  %v1230_v61 = vld [vmem:[%s1609_s1 + $0x100] sm:$0xff]  }
  0x14   :  { %1057 = vmatpush3.bf16.msra.mxu0 %v1201_v19  ;;  %v47_v62 = vld [vmem:[%s1608_s0 + $0x20] sm:$0xff] }
  0x15   :  { %1079 = vmatpush3.bf16.msra.mxu1 %v1202_v20  ;;  %1058 = vmatprep.subr.bf16.mxu0 %v1203_v21 }
  0x16   :  { %1080 = vmatprep.subr.bf16.mxu1 %v1204_v22 }
  0x18   :  { %1059 = vmatpush3.bf16.msra.mxu0 %v1205_v23 }
  0x19   :  { %1081 = vmatpush3.bf16.msra.mxu1 %v1206_v24  ;;  %1060 = vmatprep.subr.bf16.mxu0 %v1207_v25 }
  0x1a   :  { %1082 = vmatprep.subr.bf16.mxu1 %v1208_v26 }
  0x1c   :  { %1061 = vmatpush3.bf16.msra.mxu0 %v1209_v27 }
  0x1d   :  { %1083 = vmatpush3.bf16.msra.mxu1 %v1210_v28  ;;  %1062 = vmatprep.subr.bf16.mxu0 %v1211_v29 }
  0x1e   :  { %1084 = vmatprep.subr.bf16.mxu1 %v1212_v30 }
  0x20   :  { %1063 = vmatpush3.bf16.msra.mxu0 %v1213_v31 }
  0x21   :  { %1085 = vmatpush3.bf16.msra.mxu1 %v1214_v32  ;;  %1092 = vmatprep.subr.bf16.mxu0 %v1215_v41 }
  0x22   :  { %1134 = vmatprep.subr.bf16.mxu1 %v1280_v2 }
  0x23   :  { %486 = vmatmul.mubr.bf16.vlgmr.msra.gmra.mxu0 %v50_v38 }
  0x24   :  { %526 = vmatmul.mubr.bf16.vlgmr.msra.gmra.mxu1 %v52_v40  ;;  %1093 = vmatpush3.bf16.msra.mxu0 %v1216_v42 }
  0x25   :  { %1136 = vmatprep.mubr.msk.bf16.mxu1 %vm1281_vm0, %v1280_v2  ;;  %1094 = vmatprep.subr.bf16.mxu0 %v1217_v43 }
  0x26   :  { %1135 = vmatpush3.bf16.msra.mxu1 %v1231_v52  ;;  %565 = vmatprep.mubr.bf16.mxu0 %v55_v54 }
  0x27   :  { %1140 = vmatprep.subr.bf16.mxu1 %v1280_v2 }
  0x28   :  { %1095 = vmatpush3.bf16.msra.mxu0 %v1218_v44 }
  0x29   :  { %1096 = vmatprep.subr.bf16.mxu0 %v1219_v45 }
  0x2c   :  { %1097 = vmatpush3.bf16.msra.mxu0 %v1220_v46  ;;  %1137 = vmatmul.mubr.msk.bf16.vlgmr.msra.gmra.mxu1 %vm449_vm1, %v56_v57 }
  0x2d   :  { %1098 = vmatprep.subr.bf16.mxu0 %v1221_v47  ;;  %1156 = vmatprep.mubr.msk.bf16.mxu1 %vm1281_vm0, %v1280_v2 }
  0x30   :  { %1099 = vmatpush3.bf16.msra.mxu0 %v1222_v48 }
  0x31   :  { %1100 = vmatprep.subr.bf16.mxu0 %v1223_v49 }
  0x34   :  { %1101 = vmatpush3.bf16.msra.mxu0 %v1224_v50 }
  0x35   :  { %1102 = vmatprep.subr.bf16.mxu0 %v1225_v51 }
  0x38   :  { %1103 = vmatpush3.bf16.msra.mxu0 %v1226_v56 }
  0x39   :  { %1104 = vmatprep.subr.bf16.mxu0 %v1227_v58 }
  0x3c   :  { %1105 = vmatpush3.bf16.msra.mxu0 %v1228_v59 }
  0x3d   :  { %15 = vsyncpa [#allocation6], 0  ;;  %1106 = vmatprep.subr.bf16.mxu0 %v1229_v60  ;;  %v54_v63 = vpack.c.bf16 %v47_v62, %v47_v62  ;;  %v1232_v0 = vld [vmem:[%s1612_s4 + $0x38] sm:$0xff]   ;;  %v1233_v1 = vld [vmem:[%s1612_s4 + $0x30] sm:$0xff]   ;;  %v654_v56 = vlaneseq }
  0x3e   :  { %1141 = vmatpush3.bf16.msra.mxu1 %v1232_v0  ;;  %v1234_v3 = vld [vmem:[%s1612_s4 + $0x28] sm:$0xff]   ;;  %v1235_v4 = vld [vmem:[%s1612_s4 + $0x20] sm:$0xff]   ;;  %v1236_v5 = vld [vmem:[%s1612_s4 + $0x18] sm:$0xff]  }
  0x3f   :  { %1142 = vmatprep.subr.bf16.mxu1 %v1280_v2  ;;  %v1237_v6 = vld [vmem:[%s1612_s4 + $0x10] sm:$0xff]   ;;  %v1238_v7 = vld [vmem:[%s1612_s4 + $0x8] sm:$0xff]   ;;  %v1239_v8 = vld [vmem:[%s1612_s4] sm:$0xff]   ;;  %v655_v57 = vshrl.u32 %v654_v56, 7 }
  0x40   :  { %1107 = vmatpush3.bf16.msra.mxu0 %v1230_v61  ;;  %v616_v41 = vld [vmem:[#allocation3] sm:$0x1]  ;;  %v625_v44 = vld [vmem:[#allocation4] sm:$0x1] }
  0x41   :  { %1160 = vmatprep.subr.bf16.mxu0 %v1280_v2  ;;  %v641_v58 = vld [vmem:[%s1610_s2] sm:$0x1]  ;;  %v1551_v59 = vsub.s32 0, %v655_v57 }
  0x42   :  { %1143 = vmatpush3.bf16.msra.mxu1 %v1233_v1  ;;  %v642_v62 = vld [vmem:[%s1611_s3] sm:$0x1] }
  0x43   :  { %566 = vmatmul.mubr.bf16.vlgmr.msra.gmra.mxu0 %v54_v63  ;;  %1144 = vmatprep.subr.bf16.mxu1 %v1280_v2 }
  0x44   :  { %1176 = vmatprep.mubr.msk.bf16.mxu0 %vm1281_vm0, %v1280_v2 }
  0x46   :  { %1145 = vmatpush3.bf16.msra.mxu1 %v1234_v3 }
  0x47   :  { %1146 = vmatprep.subr.bf16.mxu1 %v1280_v2 }
  0x4a   :  { %1147 = vmatpush3.bf16.msra.mxu1 %v1235_v4 }
  0x4b   :  { %1148 = vmatprep.subr.bf16.mxu1 %v1280_v2 }
  0x4e   :  { %1149 = vmatpush3.bf16.msra.mxu1 %v1236_v5 }
  0x4f   :  { %1150 = vmatprep.subr.bf16.mxu1 %v1280_v2 }
  0x52   :  { %1151 = vmatpush3.bf16.msra.mxu1 %v1237_v6 }
  0x53   :  { %1152 = vmatprep.subr.bf16.mxu1 %v1280_v2 }
  0x56   :  { %1153 = vmatpush3.bf16.msra.mxu1 %v1238_v7 }
  0x57   :  { %1154 = vmatprep.subr.bf16.mxu1 %v1280_v2 }
  0x5a   :  { %1155 = vmatpush3.bf16.msra.mxu1 %v1239_v8  ;;  %v1240_v8 = vld [vmem:[%s1615_s7 + $0x38] sm:$0xff]  }
  0x5b   :  { %1161 = vmatpush3.bf16.msra.mxu0 %v1240_v8 }
  0x5c   :  { %1162 = vmatprep.subr.bf16.mxu0 %v1280_v2 }
  0xe3   :  { %v1064_v9 = vpop.f32.mrf.mxu0 }
  0xe4   :  { %v1086_v10 = vpop.f32.mrf.mxu1 }
  0xe5   :  { %v1065_v11 = vpop.f32.mrf.mxu0 }
  0xe6   :  { %v1087_v12 = vpop.f32.mrf.mxu1  ;;  %v1066_v21 = vadd.f32 %v1065_v11, %v1064_v9  ;;  %v1241_v9 = vld [vmem:[%s1615_s7 + $0x30] sm:$0xff]   ;;  %v1243_v11 = vld [vmem:[%s1615_s7 + $0x20] sm:$0xff]  }
  0xe7   :  { %v1067_v13 = vpop.f32.mrf.mxu0  ;;  %v1088_v22 = vadd.f32 %v1087_v12, %v1086_v10  ;;  %1163 = vmatpush3.bf16.msra.mxu0 %v1241_v9  ;;  %v1242_v10 = vld [vmem:[%s1615_s7 + $0x28] sm:$0xff]   ;;  %v1244_v12 = vld [vmem:[%s1615_s7 + $0x18] sm:$0xff]  }
  0xe8   :  { %v1089_v14 = vpop.f32.mrf.mxu1  ;;  %1164 = vmatprep.subr.bf16.mxu0 %v1280_v2  ;;  %v1245_v13 = vld [vmem:[%s1615_s7 + $0x10] sm:$0xff]  }
  0xe9   :  { %v1068_v15 = vpop.f32.mrf.mxu0  ;;  %v528_v25 = vadd.f32 %v1088_v22, %v1066_v21  ;;  %v1246_v14 = vld [vmem:[%s1615_s7 + $0x8] sm:$0xff]  }
  0xea   :  { %v1090_v16 = vpop.f32.mrf.mxu1  ;;  %v1247_v15 = vld [vmem:[%s1615_s7] sm:$0xff]  }
  0xeb   :  { %1165 = vmatpush3.bf16.msra.mxu0 %v1242_v10 }
  0xec   :  { %v607_v17 = vpop.f32.mrf.mxu1  ;;  %1166 = vmatprep.subr.bf16.mxu0 %v1280_v2 }
  0xee   :  { %v1138_v18 = vpop.f32.mrf.mxu1 }
  0xef   :  { %1167 = vmatpush3.bf16.msra.mxu0 %v1243_v11  ;;  %v918_v11 = vld [vmem:[%s1616_s8] sm:$0x1]  ;;  %s1282_s8 = smov [#allocation5]  }
  0xf0   :  { %v610_v19 = vpop.f32.mrf.mxu1  ;;  %1168 = vmatprep.subr.bf16.mxu0 %v1280_v2 }
  0xf2   :  { %v1139_v20 = vpop.f32.mrf.mxu1 }
  0xf3   :  { %1169 = vmatpush3.bf16.msra.mxu0 %v1244_v12 }
  0xf4   :  { %1170 = vmatprep.subr.bf16.mxu0 %v1280_v2 }
  0xf7   :  { %1171 = vmatpush3.bf16.msra.mxu0 %v1245_v13 }
  0xf8   :  { %1172 = vmatprep.subr.bf16.mxu0 %v1280_v2 }
  0xfb   :  { %1173 = vmatpush3.bf16.msra.mxu0 %v1246_v14  ;;  %v919_v14 = vld [vmem:[%s1617_s9] sm:$0x1]  ;;  %s974_s9 = sshll.u32 %s1282_s8, 4  ;;  %s975_s9 = int_to_ptr.vmem [resolvable:$true] %s974_s9 }
  0xfc   :  { %1174 = vmatprep.subr.bf16.mxu0 %v1280_v2  ;;  %s1258_s4 = scalar_lea.vmem %s975_s9, 128  ;;  %p1263_p1 = scmp.lt.s32.totalorder %s975_s9, %s975_s9 }
  0xfd   :  { %p1259_p0 = scmp.ne.s32.totalorder %s975_s9, %s1258_s4  ;;  %p1264_p2 = scmp.lt.s32.totalorder %s1258_s4, %s1258_s4 }
  0xff   :  { %1175 = vmatpush3.bf16.msra.mxu0 %v1247_v15  ;;  %p1265_p3 = por %p1264_p2, %p1263_p1 }
 0x101   :  { %p1266_p4 = pnand %p1265_p3, %p1259_p0 }
 0x103   :  { %v1108_v23 = vpop.f32.mrf.mxu0 }
 0x105   :  { %v1109_v24 = vpop.f32.mrf.mxu0 }
 0x106   :  { %v1110_v26 = vadd.f32 %v1109_v24, %v1108_v23 }
 0x107   :  { %v1111_v27 = vpop.f32.mrf.mxu0 }
 0x108   :  { %v568_v28 = vadd.f32 %v1110_v26, %v528_v25 }
 0x109   :  { %v1112_v29 = vpop.f32.mrf.mxu0 }
 0x10a   :  { %v608_v30 = vadd.f32 %v607_v17, %v568_v28 }
 0x10c   :  { %v617_v31 = vrot.slane %v608_v30, 4  ;;  %v626_v32 = vmul.f32 %v608_v30, %v608_v30 }
 0x10e   :  { %v618_v33 = vadd.f32 %v617_v31, %v608_v30  ;;  %v627_v34 = vrot.slane %v626_v32, 4 }
 0x110   :  { %v619_v35 = vrot.slane %v618_v33, 2  ;;  %v628_v36 = vadd.f32 %v627_v34, %v626_v32 }
 0x112   :  { %v620_v37 = vadd.f32 %v619_v35, %v618_v33  ;;  %v629_v38 = vrot.slane %v628_v36, 2 }
 0x114   :  { %v621_v39 = vrot.slane %v620_v37, 1  ;;  %v630_v40 = vadd.f32 %v629_v38, %v628_v36  ;;  %v773_v38 = vld [vmem:[%s1613_s5] sm:$0x1] }
 0x116   :  { %v622_v42 = vadd.f32 %v621_v39, %v620_v37  ;;  %v631_v43 = vrot.slane %v630_v40, 1 }
 0x118   :  { %v623_v45 = vadd.f32 %v622_v42, %v616_v41  ;;  %v632_v46 = vadd.f32 %v631_v43, %v630_v40  ;;  %v774_v41 = vld [vmem:[%s1614_s6] sm:$0x1] }
 0x11a   :  { %624 = vst [vmem:[#allocation3] sm:$0x1] %v623_v45  ;;  %v633_v47 = vadd.f32 %v632_v46, %v625_v44 }
 0x11c   :  { %634 = vst [vmem:[#allocation4] sm:$0x1] %v633_v47 }
 0x121   :  { %v639_v48 = vld [vmem:[#allocation3] sm:$0x1] }
 0x122   :  { %v643_v49 = vmul.f32 0.125, %v639_v48 }
 0x123   :  { %v640_v50 = vld [vmem:[#allocation4] sm:$0x1] }
 0x124   :  { %v644_v51 = vmul.f32 0.125, %v640_v50  ;;  %v645_v52 = vmul.f32 %v643_v49, %v643_v49 }
 0x126   :  { %v646_v53 = vsub.f32 %v644_v51, %v645_v52 }
 0x128   :  { %v647_v54 = vmax.f32 %v646_v53, 0.0 }
 0x12a   :  { %v648_v55 = vadd.f32 1e-05, %v647_v54 }
 0x12c   :  { %1248 = vrsqrt.f32 %v648_v55 }
 0x139   :  { %v1249_v60 = vpop.eup %1248 }
 0x13a   :  { %v650_v61 = vmul.f32 %v1249_v60, %v641_v58 }
 0x13c   :  { %v651_v63 = vmul.f32 %v650_v61, %v643_v49  ;;  %v657_v0 = vrot.slane %v650_v61, %v1551_v59 }
 0x13e   :  { %v652_v1 = vsub.f32 %v642_v62, %v651_v63  ;;  %v659_v3 = vmul.f32 %v657_v0, %v608_v30 }
 0x140   :  { %v664_v4 = vrot.slane %v652_v1, %v1551_v59 }
 0x142   :  { %v666_v5 = vadd.f32 %v664_v4, %v659_v3 }
 0x144   :  { %v667_v6 = vmax.f32 %v666_v5, 0.0 }
 0x146   :  { %v668_v7 = vpack.c.bf16 %v667_v6, %v667_v6 }
 0x148   :  { %1157 = vmatmul.mubr.bf16.vlgmr.msra.gmra.mxu1 %v668_v7 }
 0x208   :  { %v767_v16 = vpop.f32.mrf.mxu1 }
 0x209   :  { %v775_v17 = vrot.slane %v767_v16, 4  ;;  %v781_v18 = vmul.f32 %v767_v16, %v767_v16 }
 0x20a   :  { %v1158_v19 = vpop.f32.mrf.mxu1 }
 0x20b   :  { %v776_v20 = vadd.f32 %v775_v17, %v767_v16  ;;  %v782_v21 = vrot.slane %v781_v18, 4 }
 0x20c   :  { %v770_v22 = vpop.f32.mrf.mxu1 }
 0x20d   :  { %v777_v23 = vrot.slane %v776_v20, 2  ;;  %v783_v24 = vadd.f32 %v782_v21, %v781_v18 }
 0x20e   :  { %v1159_v25 = vpop.f32.mrf.mxu1 }
 0x20f   :  { %v778_v26 = vadd.f32 %v777_v23, %v776_v20  ;;  %v784_v27 = vrot.slane %v783_v24, 2 }
 0x211   :  { %v779_v28 = vrot.slane %v778_v26, 1  ;;  %v785_v29 = vadd.f32 %v784_v27, %v783_v24 }
 0x213   :  { %v780_v2 = vadd.f32 %v779_v28, %v778_v26  ;;  %v786_v30 = vrot.slane %v785_v29, 1 }
 0x215   :  { %v787_v31 = vadd.f32 %v786_v30, %v785_v29  ;;  %v788_v32 = vmul.f32 0.125, %v780_v2 }
 0x217   :  { %v789_v33 = vmul.f32 0.125, %v787_v31  ;;  %v790_v34 = vmul.f32 %v788_v32, %v788_v32 }
 0x219   :  { %v791_v35 = vsub.f32 %v789_v33, %v790_v34 }
 0x21b   :  { %v792_v36 = vmax.f32 %v791_v35, 0.0 }
 0x21d   :  { %v793_v37 = vadd.f32 1e-05, %v792_v36 }
 0x21f   :  { %1250 = vrsqrt.f32 %v793_v37 }
 0x22c   :  { %v1251_v39 = vpop.eup %1250 }
 0x22d   :  { %v795_v40 = vmul.f32 %v1251_v39, %v773_v38 }
 0x22f   :  { %v796_v42 = vmul.f32 %v795_v40, %v788_v32  ;;  %v802_v43 = vrot.slane %v795_v40, %v1551_v59 }
 0x231   :  { %v797_v44 = vsub.f32 %v774_v41, %v796_v42  ;;  %v804_v45 = vmul.f32 %v802_v43, %v767_v16 }
 0x233   :  { %v809_v46 = vrot.slane %v797_v44, %v1551_v59 }
 0x235   :  { %v811_v47 = vadd.f32 %v809_v46, %v804_v45 }
 0x237   :  { %v812_v48 = vmax.f32 %v811_v47, 0.0 }
 0x239   :  { %v813_v49 = vpack.c.bf16 %v812_v48, %v812_v48 }
 0x23b   :  { %1177 = vmatmul.mubr.bf16.vlgmr.msra.gmra.mxu0 %v813_v49 }
 0x2fb   :  { %v912_v50 = vpop.f32.mrf.mxu0 }
 0x2fc   :  { %v920_v51 = vrot.slane %v912_v50, 4  ;;  %v926_v52 = vmul.f32 %v912_v50, %v912_v50 }
 0x2fd   :  { %v1178_v53 = vpop.f32.mrf.mxu0 }
 0x2fe   :  { %v921_v54 = vadd.f32 %v920_v51, %v912_v50  ;;  %v927_v55 = vrot.slane %v926_v52, 4 }
 0x2ff   :  { %v915_v56 = vpop.f32.mrf.mxu0 }
 0x300   :  { %v922_v57 = vrot.slane %v921_v54, 2  ;;  %v928_v58 = vadd.f32 %v927_v55, %v926_v52 }
 0x301   :  { %v1179_v60 = vpop.f32.mrf.mxu0 }
 0x302   :  { %v923_v61 = vadd.f32 %v922_v57, %v921_v54  ;;  %v929_v62 = vrot.slane %v928_v58, 2 }
 0x304   :  { %v924_v63 = vrot.slane %v923_v61, 1  ;;  %v930_v0 = vadd.f32 %v929_v62, %v928_v58 }
 0x306   :  { %v925_v1 = vadd.f32 %v924_v63, %v923_v61  ;;  %v931_v3 = vrot.slane %v930_v0, 1 }
 0x308   :  { %v932_v4 = vadd.f32 %v931_v3, %v930_v0  ;;  %v933_v5 = vmul.f32 0.125, %v925_v1 }
 0x30a   :  { %v934_v6 = vmul.f32 0.125, %v932_v4  ;;  %v935_v7 = vmul.f32 %v933_v5, %v933_v5 }
 0x30c   :  { %v936_v8 = vsub.f32 %v934_v6, %v935_v7 }
 0x30e   :  { %v937_v9 = vmax.f32 %v936_v8, 0.0 }
 0x310   :  { %v938_v10 = vadd.f32 1e-05, %v937_v9 }
 0x312   :  { %1252 = vrsqrt.f32 %v938_v10 }
 0x31f   :  { %v1253_v12 = vpop.eup %1252 }
 0x320   :  { %v940_v13 = vmul.f32 %v1253_v12, %v918_v11 }
 0x322   :  { %v941_v15 = vmul.f32 %v940_v13, %v933_v5  ;;  %v947_v16 = vrot.slane %v940_v13, %v1551_v59 }
 0x324   :  { %v942_v17 = vsub.f32 %v919_v14, %v941_v15  ;;  %v949_v18 = vmul.f32 %v947_v16, %v912_v50 }
 0x326   :  { %v954_v19 = vrot.slane %v942_v17, %v1551_v59 }
 0x328   :  { %v956_v20 = vadd.f32 %v954_v19, %v949_v18 }
 0x32a   :  { %957 = vmax.xlane.f32.xlu0 %v956_v20 }
 0x3b3   :  { %v958_v21 = vpop.xlane.xlu0 %957 }
 0x3b4   :  { %v959_v22 = vsub.f32 %v956_v20, %v958_v21 }
 0x3b6   :  { %v960_v23 = vmul.f32 1.442695, %v959_v22 }
 0x3b8   :  { %1254 = vpow2.f32 %v960_v23 }
 0x3c5   :  { %v1255_v24 = vpop.eup %1254 }
 0x3c6   :  { %962 = vadd.xlane.f32.xlu0 %v1255_v24 }
 0x44f   :  { %v963_v25 = vpop.xlane.xlu0 %962 }
 0x450   :  { %1256 = vlog2.f32 %v963_v25 }
 0x45d   :  { %v1257_v26 = vpop.eup %1256 }
 0x45e   :  { %v965_v27 = vmul.f32 0.6931472, %v1257_v26 }
 0x460   :  { %v966_v28 = vsub.f32 %v959_v22, %v965_v27 }
 0x462   :  { %967 = vst [vmem:[#allocation5] sm:$0xff] %v966_v28 }
 0x463   :  { %1269 = shalt.err (!%p1266_p4)
}
 0x464   :  { %977 = dma.vmem_to_hbm [thread:$0]  %s975_s9, 128, %s1618_s10, [#allocation6]  }
 0x465   :  { %1278 = dma.done.wait [#allocation6], 128  }
 0x466   :  { %1279 = vsyncadd [#allocation6], 4294967168 }
 0x467   :  { %981 = vsyncpa [#allocation6], 1 }

</bundles_post_ra>
